<compile_context>
chip_gen: v7x
topology: tpu7x:2x2x1
jax: 0.10.0
libtpu: 0.0.40
codegen_flags: <defaults>
</compile_context>

<pallas_src>
import functools

import jax
import jax.numpy as jnp
from jax.experimental import pallas as pl
from jax.experimental.pallas import tpu as pltpu


def _round_up(v, m):
    return ((v + m - 1) // m) * m


def _sigmoid_via_tanh(z):
    # sigmoid(z) == 0.5 * (tanh(0.5 * z) + 1): one EUP op, no divide.
    return 0.5 * (jnp.tanh(0.5 * z) + 1.0)


# --------------------------------------------------------------------------
# Kernel: one row tile of the gated-attention MLP, all five Linears fused.
# --------------------------------------------------------------------------
def _attn_double_kernel(x_ref,
                        wab_ref, bab_ref,
                        wcd_ref, bcd_ref,
                        wfc_ref, bfc_ref,
                        o_ref, *, M, D, act_dtype):
    x = x_ref[...]                                        # already MXU operand dtype

    # Stage 1: fused gated projection L -> 2M (tanh half | sigmoid half).
    h = jnp.dot(x, wab_ref[...], preferred_element_type=jnp.float32) + bab_ref[...]
    a = jnp.tanh(h[:, :M].astype(act_dtype))
    b = _sigmoid_via_tanh(h[:, M:].astype(act_dtype))
    gated = (a * b).astype(wcd_ref.dtype)                 # (TN, M)

    # Stage 2: fused gated projection M -> 2D (tanh half | sigmoid half).
    g = jnp.dot(gated, wcd_ref[...], preferred_element_type=jnp.float32) + bcd_ref[...]
    c = jnp.tanh(g[:, :D].astype(act_dtype))
    d = _sigmoid_via_tanh(g[:, D:].astype(act_dtype))
    cd = (c * d).astype(wfc_ref.dtype)                    # (TN, D)

    # Final fc: D -> 128 padded lanes (only the first n_classes are real).
    out = jnp.dot(cd, wfc_ref[...], preferred_element_type=jnp.float32) + bfc_ref[...]
    o_ref[...] = out.astype(o_ref.dtype)


# --------------------------------------------------------------------------
# One-time parameter preparation (hoisted out of the per-call path).
# --------------------------------------------------------------------------
def fuse_params(params, compute_dtype=jnp.bfloat16):
    """Fuse each stage's weight pair into one wide MXU operand and pad the
    final projection to 128 output lanes.  Call once at init; pass the result
    to attn_net_double().  compute_dtype=jnp.bfloat16 is the fast MXU path on
    all generations (f32 accumulation is kept inside the kernel)."""
    L, M = params["wa"].shape
    D = params["wc"].shape[1]
    C = params["wfc"].shape[1]
    Cp = _round_up(max(C, 1), 128)

    wfc_p = jnp.zeros((D, Cp), compute_dtype).at[:, :C].set(
        params["wfc"].astype(compute_dtype))
    bfc_p = jnp.zeros((1, Cp), jnp.float32).at[:, :C].set(
        params["bfc"].astype(jnp.float32).reshape(1, C))

    return {
        "wab": jnp.concatenate([params["wa"], params["wb"]], axis=1).astype(compute_dtype),
        "bab": jnp.concatenate([params["ba"], params["bb"]]).reshape(1, 2 * M).astype(jnp.float32),
        "wcd": jnp.concatenate([params["wc"], params["wd"]], axis=1).astype(compute_dtype),
        "bcd": jnp.concatenate([params["bc"], params["bd"]]).reshape(1, 2 * D).astype(jnp.float32),
        "wfc": wfc_p,
        "bfc": bfc_p,
    }


# --------------------------------------------------------------------------
# Jitted forward.
# --------------------------------------------------------------------------
@functools.partial(jax.jit,
                   static_argnames=("n_classes", "tile_n", "weight_buffers", "act_dtype"))
def _attn_forward(x, fused, n_classes, tile_n, weight_buffers, act_dtype):
    N, L = x.shape
    wab, bab = fused["wab"], fused["bab"]
    wcd, bcd = fused["wcd"], fused["bcd"]
    wfc, bfc = fused["wfc"], fused["bfc"]
    M = wab.shape[1] // 2
    D = wcd.shape[1] // 2
    Cp = wfc.shape[1]

    # Cast the rows to the MXU operand dtype in the wrapper (halves the x-tile
    # HBM->VMEM DMA and its double buffer when bf16 weights are used).
    x_c = x.astype(wab.dtype)

    # Row tile: large (tile_n, default 512) for big N to amortize per-step
    # overhead; >= 2 tiles for small/medium N so the v7x megacore has work for
    # both TensorCores.  Always a multiple of 8 (sublane).
    if N <= 16:
        tn = _round_up(N, 8)
    elif N <= 2 * tile_n:
        tn = _round_up(-(-N // 2), 8)
    else:
        tn = tile_n
    Np = _round_up(N, tn)
    x_p = jnp.pad(x_c, ((0, Np - N), (0, 0))) if Np != N else x_c
    grid = (Np // tn,)

    # Constant-index weight/bias blocks: only one buffer is ever needed.
    w_pipe = {"pipeline_mode": pl.Buffered(weight_buffers)} if weight_buffers != 2 else {}

    def full(shape):
        return pl.BlockSpec(shape, lambda i: (0, 0), **w_pipe)

    row_in = pl.BlockSpec((tn, L), lambda i: (i, 0))
    row_out = pl.BlockSpec((tn, Cp), lambda i: (i, 0))

    # Advisory cost estimate for XLA's scheduler.
    flops = 2 * Np * (L * 2 * M + M * 2 * D + D * Cp)
    transcendentals = 2 * Np * (M + D)
    bytes_accessed = (
        x_p.size * x_p.dtype.itemsize
        + sum(w.size * w.dtype.itemsize for w in (wab, bab, wcd, bcd, wfc, bfc))
        + Np * Cp * jnp.dtype(x.dtype).itemsize)
    cost = pl.CostEstimate(flops=flops, transcendentals=transcendentals,
                           bytes_accessed=bytes_accessed)

    out = pl.pallas_call(
        functools.partial(_attn_double_kernel, M=M, D=D, act_dtype=act_dtype),
        out_shape=jax.ShapeDtypeStruct((Np, Cp), x.dtype),
        grid_spec=pltpu.PrefetchScalarGridSpec(
            num_scalar_prefetch=0,
            grid=grid,
            in_specs=[
                row_in,
                full((L, 2 * M)), full((1, 2 * M)),   # Wa|Wb, ba|bb
                full((M, 2 * D)), full((1, 2 * D)),   # Wc|Wd, bc|bd
                full((D, Cp)),    full((1, Cp)),      # Wfc (lane-padded), bfc
            ],
            out_specs=row_out,
        ),
        compiler_params=pltpu.CompilerParams(
            dimension_semantics=("parallel",),
            # Explicit VMEM budget: above v5e (16 MiB) / v6e (32 MiB) default
            # scoped limits, comfortably under v7x's 64 MiB physical VMEM.
            vmem_limit_bytes=48 * 1024 * 1024,
        ),
        cost_estimate=cost,
    )(x_p, wab, bab, wcd, bcd, wfc, bfc)

    return out[:N, :n_classes]


# Resolved lazily: 1 if this jax/Mosaic build accepts pl.Buffered(1) for the
# constant weight blocks, else 2 (default double buffering).
_WEIGHT_BUFFERS = None


def attn_net_double(x, fused, n_classes, *, tile_n=512, act_dtype=jnp.float32):
    """Forward pass of Attn_Net_Double.  `fused` comes from fuse_params().
    Returns (A, x) like the PyTorch module, A of shape (N, n_classes).

    act_dtype=jnp.bfloat16 is an optional v6e/v7x EUP optimization for the
    tanh/sigmoid halves (keep the default f32 on v5e)."""
    global _WEIGHT_BUFFERS
    if _WEIGHT_BUFFERS is None:
        try:
            A = _attn_forward(x, fused, n_classes, tile_n, 1, act_dtype)
            _WEIGHT_BUFFERS = 1
            return A, x
        except Exception:
            # pl.Buffered(1) not supported by this build: fall back to the
            # default 2-deep pipeline (constant blocks are still DMA'd once).
            _WEIGHT_BUFFERS = 2
    A = _attn_forward(x, fused, n_classes, tile_n, _WEIGHT_BUFFERS, act_dtype)
    return A, x


# --------------------------------------------------------------------------
# Synthetic parameters + pure-JAX reference.
# --------------------------------------------------------------------------
def init_params(key, L, M, D, C, dtype=jnp.float32):
    """Deterministic synthetic parameters, stored as (in, out) matrices."""
    ks = jax.random.split(key, 10)
    s1 = 1.0 / jnp.sqrt(L)
    s2 = 1.0 / jnp.sqrt(M)
    s3 = 1.0 / jnp.sqrt(D)
    return {
        "wa": jax.random.uniform(ks[0], (L, M), dtype, -s1, s1),
        "ba": jax.random.uniform(ks[1], (M,), dtype, -s1, s1),
        "wb": jax.random.uniform(ks[2], (L, M), dtype, -s1, s1),
        "bb": jax.random.uniform(ks[3], (M,), dtype, -s1, s1),
        "wc": jax.random.uniform(ks[4], (M, D), dtype, -s2, s2),
        "bc": jax.random.uniform(ks[5], (D,), dtype, -s2, s2),
        "wd": jax.random.uniform(ks[6], (M, D), dtype, -s2, s2),
        "bd": jax.random.uniform(ks[7], (D,), dtype, -s2, s2),
        "wfc": jax.random.uniform(ks[8], (D, C), dtype, -s3, s3),
        "bfc": jax.random.uniform(ks[9], (C,), dtype, -s3, s3),
    }


def reference(x, p):
    a = jnp.tanh(x @ p["wa"] + p["ba"])
    b = jax.nn.sigmoid(x @ p["wb"] + p["bb"])
    A = a * b
    c = jnp.tanh(A @ p["wc"] + p["bc"])
    d = jax.nn.sigmoid(A @ p["wd"] + p["bd"])
    return (c * d) @ p["wfc"] + p["bfc"]


if __name__ == "__main__":
    # Small shapes consistent with the module (production: L=1024, M=512,
    # D=256, n_classes=1; production runs should keep the defaults:
    # bf16 fused weights, tile_n=512).
    N, L, M, D, C = 64, 32, 16, 8, 1

    key = jax.random.PRNGKey(0)
    kx, kp, kx2 = jax.random.split(key, 3)
    x = jax.random.normal(kx, (N, L), jnp.float32)
    params = init_params(kp, L, M, D, C)
    ref = reference(x, params)

    # 1) f32 operand path: tight numerical check against the f32 reference.
    fused_f32 = fuse_params(params, compute_dtype=jnp.float32)
    A32, x_out = attn_net_double(x, fused_f32, n_classes=C)
    A32 = jax.block_until_ready(A32)
    assert A32.shape == (N, C), A32.shape
    assert x_out.shape == x.shape
    assert jnp.allclose(A32, ref, atol=2e-5, rtol=1e-4), \
        float(jnp.max(jnp.abs(A32 - ref)))
    assert jnp.array_equal(x_out, x)

    # 2) Default fast path: bf16 MXU operands, f32 accumulation (looser tol).
    fused_bf16 = fuse_params(params)  # compute_dtype=jnp.bfloat16
    A16, _ = attn_net_double(x, fused_bf16, n_classes=C)
    A16 = jax.block_until_ready(A16)
    assert A16.shape == (N, C)
    assert jnp.allclose(A16, ref, atol=5e-2, rtol=5e-2), \
        float(jnp.max(jnp.abs(A16 - ref)))

    # 3) Ragged N (not a multiple of 8): exercises pad + slice path.
    x2 = jax.random.normal(kx2, (37, L), jnp.float32)
    A2, _ = attn_net_double(x2, fused_bf16, n_classes=C)
    A2 = jax.block_until_ready(A2)
    assert A2.shape == (37, C)
    assert jnp.allclose(A2, reference(x2, params), atol=5e-2, rtol=5e-2)

    print("KERNEL_OK")
</pallas_src>

<mosaic_0001>
module attributes {stable_mosaic.version = 11 : i64} {
  func.func @_attn_double_kernel(%arg0: i32, %arg1: memref<32x32xf32, #tpu.memory_space<vmem>>, %arg2: memref<32x32xf32, #tpu.memory_space<vmem>>, %arg3: memref<1x32xf32, #tpu.memory_space<vmem>>, %arg4: memref<16x16xf32, #tpu.memory_space<vmem>>, %arg5: memref<1x16xf32, #tpu.memory_space<vmem>>, %arg6: memref<8x128xf32, #tpu.memory_space<vmem>>, %arg7: memref<1x128xf32, #tpu.memory_space<vmem>>, %arg8: memref<32x128xf32, #tpu.memory_space<vmem>>) attributes {dimension_semantics = [#tpu.dimension_semantics<parallel>], iteration_bounds = array<i64: 2>, scalar_prefetch = 0 : i64, scratch_operands = 0 : i64, tpu.core_type = #tpu.core_type<tc>, window_params = [{transform_indices = @transform_0, window_bounds = array<i64: 32, 32>}, {pipeline_mode = #tpu.pipeline_mode<synchronous>, transform_indices = @transform_1, window_bounds = array<i64: 32, 32>}, {pipeline_mode = #tpu.pipeline_mode<synchronous>, transform_indices = @transform_2, window_bounds = array<i64: 1, 32>}, {pipeline_mode = #tpu.pipeline_mode<synchronous>, transform_indices = @transform_3, window_bounds = array<i64: 16, 16>}, {pipeline_mode = #tpu.pipeline_mode<synchronous>, transform_indices = @transform_4, window_bounds = array<i64: 1, 16>}, {pipeline_mode = #tpu.pipeline_mode<synchronous>, transform_indices = @transform_5, window_bounds = array<i64: 8, 128>}, {pipeline_mode = #tpu.pipeline_mode<synchronous>, transform_indices = @transform_6, window_bounds = array<i64: 1, 128>}, {transform_indices = @transform_7, window_bounds = array<i64: 32, 128>}]} {
    %c0 = arith.constant 0 : index
    %c0_0 = arith.constant 0 : index
    %0 = vector.load %arg1[%c0, %c0_0] : memref<32x32xf32, #tpu.memory_space<vmem>>, vector<32x32xf32>
    %c0_1 = arith.constant 0 : index
    %c0_2 = arith.constant 0 : index
    %1 = vector.load %arg2[%c0_1, %c0_2] : memref<32x32xf32, #tpu.memory_space<vmem>>, vector<32x32xf32>
    %cst = arith.constant dense<0.000000e+00> : vector<32x32xf32>
    %2 = tpu.matmul %0, %1, %cst {dimension_numbers = #tpu.dot_dimension_numbers<[1], [0], [0], [1], [0, 0, 1, 1], [], []>} : vector<32x32xf32>, vector<32x32xf32>, vector<32x32xf32> -> vector<32x32xf32>
    %c0_3 = arith.constant 0 : index
    %c0_4 = arith.constant 0 : index
    %3 = vector.load %arg3[%c0_3, %c0_4] : memref<1x32xf32, #tpu.memory_space<vmem>>, vector<1x32xf32>
    %4 = vector.broadcast %3 : vector<1x32xf32> to vector<32x32xf32>
    %5 = arith.addf %2, %4 : vector<32x32xf32>
    %6 = vector.extract_strided_slice %5 {offsets = [0, 0], sizes = [32, 16], strides = [1, 1]} : vector<32x32xf32> to vector<32x16xf32>
    %7 = math.tanh %6 : vector<32x16xf32>
    %8 = vector.extract_strided_slice %5 {offsets = [0, 16], sizes = [32, 16], strides = [1, 1]} : vector<32x32xf32> to vector<32x16xf32>
    %cst_5 = arith.constant 5.000000e-01 : f32
    %9 = vector.broadcast %cst_5 : f32 to vector<32x16xf32>
    %10 = arith.mulf %9, %8 : vector<32x16xf32>
    %11 = math.tanh %10 : vector<32x16xf32>
    %cst_6 = arith.constant 1.000000e+00 : f32
    %12 = vector.broadcast %cst_6 : f32 to vector<32x16xf32>
    %13 = arith.addf %11, %12 : vector<32x16xf32>
    %cst_7 = arith.constant 5.000000e-01 : f32
    %14 = vector.broadcast %cst_7 : f32 to vector<32x16xf32>
    %15 = arith.mulf %14, %13 : vector<32x16xf32>
    %16 = arith.mulf %7, %15 : vector<32x16xf32>
    %c0_8 = arith.constant 0 : index
    %c0_9 = arith.constant 0 : index
    %17 = vector.load %arg4[%c0_8, %c0_9] : memref<16x16xf32, #tpu.memory_space<vmem>>, vector<16x16xf32>
    %cst_10 = arith.constant dense<0.000000e+00> : vector<32x16xf32>
    %18 = tpu.matmul %16, %17, %cst_10 {dimension_numbers = #tpu.dot_dimension_numbers<[1], [0], [0], [1], [0, 0, 1, 1], [], []>} : vector<32x16xf32>, vector<16x16xf32>, vector<32x16xf32> -> vector<32x16xf32>
    %c0_11 = arith.constant 0 : index
    %c0_12 = arith.constant 0 : index
    %19 = vector.load %arg5[%c0_11, %c0_12] : memref<1x16xf32, #tpu.memory_space<vmem>>, vector<1x16xf32>
    %20 = vector.broadcast %19 : vector<1x16xf32> to vector<32x16xf32>
    %21 = arith.addf %18, %20 : vector<32x16xf32>
    %22 = vector.extract_strided_slice %21 {offsets = [0, 0], sizes = [32, 8], strides = [1, 1]} : vector<32x16xf32> to vector<32x8xf32>
    %23 = math.tanh %22 : vector<32x8xf32>
    %24 = vector.extract_strided_slice %21 {offsets = [0, 8], sizes = [32, 8], strides = [1, 1]} : vector<32x16xf32> to vector<32x8xf32>
    %cst_13 = arith.constant 5.000000e-01 : f32
    %25 = vector.broadcast %cst_13 : f32 to vector<32x8xf32>
    %26 = arith.mulf %25, %24 : vector<32x8xf32>
    %27 = math.tanh %26 : vector<32x8xf32>
    %cst_14 = arith.constant 1.000000e+00 : f32
    %28 = vector.broadcast %cst_14 : f32 to vector<32x8xf32>
    %29 = arith.addf %27, %28 : vector<32x8xf32>
    %cst_15 = arith.constant 5.000000e-01 : f32
    %30 = vector.broadcast %cst_15 : f32 to vector<32x8xf32>
    %31 = arith.mulf %30, %29 : vector<32x8xf32>
    %32 = arith.mulf %23, %31 : vector<32x8xf32>
    %c0_16 = arith.constant 0 : index
    %c0_17 = arith.constant 0 : index
    %33 = vector.load %arg6[%c0_16, %c0_17] : memref<8x128xf32, #tpu.memory_space<vmem>>, vector<8x128xf32>
    %cst_18 = arith.constant dense<0.000000e+00> : vector<32x128xf32>
    %34 = tpu.matmul %32, %33, %cst_18 {dimension_numbers = #tpu.dot_dimension_numbers<[1], [0], [0], [1], [0, 0, 1, 1], [], []>} : vector<32x8xf32>, vector<8x128xf32>, vector<32x128xf32> -> vector<32x128xf32>
    %c0_19 = arith.constant 0 : index
    %c0_20 = arith.constant 0 : index
    %35 = vector.load %arg7[%c0_19, %c0_20] : memref<1x128xf32, #tpu.memory_space<vmem>>, vector<1x128xf32>
    %36 = vector.broadcast %35 : vector<1x128xf32> to vector<32x128xf32>
    %37 = arith.addf %34, %36 : vector<32x128xf32>
    %c0_21 = arith.constant 0 : index
    %c0_22 = arith.constant 0 : index
    %38 = vector.load %arg8[%c0_21, %c0_22] : memref<32x128xf32, #tpu.memory_space<vmem>>, vector<32x128xf32>
    tpu.vector_store %arg8[%c0_21, %c0_22], %37 {strides = array<i32>} : memref<32x128xf32, #tpu.memory_space<vmem>>, vector<32x128xf32>,
    return
  }
  func.func @transform_0(%arg0: i32) -> (i32, i32) {
    %c0_i32 = arith.constant 0 : i32
    %c0_i32_0 = arith.constant 0 : i32
    return %arg0, %c0_i32 : i32, i32
  }
  func.func @transform_1(%arg0: i32) -> (i32, i32) {
    %c0_i32 = arith.constant 0 : i32
    %c0_i32_0 = arith.constant 0 : i32
    %c0_i32_1 = arith.constant 0 : i32
    return %c0_i32, %c0_i32_0 : i32, i32
  }
  func.func @transform_2(%arg0: i32) -> (i32, i32) {
    %c0_i32 = arith.constant 0 : i32
    %c0_i32_0 = arith.constant 0 : i32
    %c0_i32_1 = arith.constant 0 : i32
    return %c0_i32, %c0_i32_0 : i32, i32
  }
  func.func @transform_3(%arg0: i32) -> (i32, i32) {
    %c0_i32 = arith.constant 0 : i32
    %c0_i32_0 = arith.constant 0 : i32
    %c0_i32_1 = arith.constant 0 : i32
    return %c0_i32, %c0_i32_0 : i32, i32
  }
  func.func @transform_4(%arg0: i32) -> (i32, i32) {
    %c0_i32 = arith.constant 0 : i32
    %c0_i32_0 = arith.constant 0 : i32
    %c0_i32_1 = arith.constant 0 : i32
    return %c0_i32, %c0_i32_0 : i32, i32
  }
  func.func @transform_5(%arg0: i32) -> (i32, i32) {
    %c0_i32 = arith.constant 0 : i32
    %c0_i32_0 = arith.constant 0 : i32
    %c0_i32_1 = arith.constant 0 : i32
    return %c0_i32, %c0_i32_0 : i32, i32
  }
  func.func @transform_6(%arg0: i32) -> (i32, i32) {
    %c0_i32 = arith.constant 0 : i32
    %c0_i32_0 = arith.constant 0 : i32
    %c0_i32_1 = arith.constant 0 : i32
    return %c0_i32, %c0_i32_0 : i32, i32
  }
  func.func @transform_7(%arg0: i32) -> (i32, i32) {
    %c0_i32 = arith.constant 0 : i32
    %c0_i32_0 = arith.constant 0 : i32
    return %arg0, %c0_i32 : i32, i32
  }
}

module attributes {stable_mosaic.version = 11 : i64} {
  func.func @_attn_double_kernel(%arg0: i32, %arg1: memref<32x32xf32, #tpu.memory_space<vmem>>, %arg2: memref<32x32xf32, #tpu.memory_space<vmem>>, %arg3: memref<1x32xf32, #tpu.memory_space<vmem>>, %arg4: memref<16x16xf32, #tpu.memory_space<vmem>>, %arg5: memref<1x16xf32, #tpu.memory_space<vmem>>, %arg6: memref<8x128xf32, #tpu.memory_space<vmem>>, %arg7: memref<1x128xf32, #tpu.memory_space<vmem>>, %arg8: memref<32x128xf32, #tpu.memory_space<vmem>>) attributes {dimension_semantics = [#tpu.dimension_semantics<parallel>], iteration_bounds = array<i64: 2>, scalar_prefetch = 0 : i64, scratch_operands = 0 : i64, tpu.core_type = #tpu.core_type<tc>, window_params = [{transform_indices = @transform_0, window_bounds = array<i64: 32, 32>}, {pipeline_mode = #tpu.pipeline_mode<synchronous>, transform_indices = @transform_1, window_bounds = array<i64: 32, 32>}, {pipeline_mode = #tpu.pipeline_mode<synchronous>, transform_indices = @transform_2, window_bounds = array<i64: 1, 32>}, {pipeline_mode = #tpu.pipeline_mode<synchronous>, transform_indices = @transform_3, window_bounds = array<i64: 16, 16>}, {pipeline_mode = #tpu.pipeline_mode<synchronous>, transform_indices = @transform_4, window_bounds = array<i64: 1, 16>}, {pipeline_mode = #tpu.pipeline_mode<synchronous>, transform_indices = @transform_5, window_bounds = array<i64: 8, 128>}, {pipeline_mode = #tpu.pipeline_mode<synchronous>, transform_indices = @transform_6, window_bounds = array<i64: 1, 128>}, {transform_indices = @transform_7, window_bounds = array<i64: 32, 128>}]} {
    %c0 = arith.constant 0 : index
    %c0_0 = arith.constant 0 : index
    %0 = vector.load %arg1[%c0, %c0_0] : memref<32x32xf32, #tpu.memory_space<vmem>>, vector<32x32xf32>
    %c0_1 = arith.constant 0 : index
    %c0_2 = arith.constant 0 : index
    %1 = vector.load %arg2[%c0_1, %c0_2] : memref<32x32xf32, #tpu.memory_space<vmem>>, vector<32x32xf32>
    %cst = arith.constant dense<0.000000e+00> : vector<32x32xf32>
    %2 = tpu.matmul %0, %1, %cst {dimension_numbers = #tpu.dot_dimension_numbers<[1], [0], [0], [1], [0, 0, 1, 1], [], []>} : vector<32x32xf32>, vector<32x32xf32>, vector<32x32xf32> -> vector<32x32xf32>
    %c0_3 = arith.constant 0 : index
    %c0_4 = arith.constant 0 : index
    %3 = vector.load %arg3[%c0_3, %c0_4] : memref<1x32xf32, #tpu.memory_space<vmem>>, vector<1x32xf32>
    %4 = vector.broadcast %3 : vector<1x32xf32> to vector<32x32xf32>
    %5 = arith.addf %2, %4 : vector<32x32xf32>
    %6 = vector.extract_strided_slice %5 {offsets = [0, 0], sizes = [32, 16], strides = [1, 1]} : vector<32x32xf32> to vector<32x16xf32>
    %7 = math.tanh %6 : vector<32x16xf32>
    %8 = vector.extract_strided_slice %5 {offsets = [0, 16], sizes = [32, 16], strides = [1, 1]} : vector<32x32xf32> to vector<32x16xf32>
    %cst_5 = arith.constant 5.000000e-01 : f32
    %9 = vector.broadcast %cst_5 : f32 to vector<32x16xf32>
    %10 = arith.mulf %9, %8 : vector<32x16xf32>
    %11 = math.tanh %10 : vector<32x16xf32>
    %cst_6 = arith.constant 1.000000e+00 : f32
    %12 = vector.broadcast %cst_6 : f32 to vector<32x16xf32>
    %13 = arith.addf %11, %12 : vector<32x16xf32>
    %cst_7 = arith.constant 5.000000e-01 : f32
    %14 = vector.broadcast %cst_7 : f32 to vector<32x16xf32>
    %15 = arith.mulf %14, %13 : vector<32x16xf32>
    %16 = arith.mulf %7, %15 : vector<32x16xf32>
    %c0_8 = arith.constant 0 : index
    %c0_9 = arith.constant 0 : index
    %17 = vector.load %arg4[%c0_8, %c0_9] : memref<16x16xf32, #tpu.memory_space<vmem>>, vector<16x16xf32>
    %cst_10 = arith.constant dense<0.000000e+00> : vector<32x16xf32>
    %18 = tpu.matmul %16, %17, %cst_10 {dimension_numbers = #tpu.dot_dimension_numbers<[1], [0], [0], [1], [0, 0, 1, 1], [], []>} : vector<32x16xf32>, vector<16x16xf32>, vector<32x16xf32> -> vector<32x16xf32>
    %c0_11 = arith.constant 0 : index
    %c0_12 = arith.constant 0 : index
    %19 = vector.load %arg5[%c0_11, %c0_12] : memref<1x16xf32, #tpu.memory_space<vmem>>, vector<1x16xf32>
    %20 = vector.broadcast %19 : vector<1x16xf32> to vector<32x16xf32>
    %21 = arith.addf %18, %20 : vector<32x16xf32>
    %22 = vector.extract_strided_slice %21 {offsets = [0, 0], sizes = [32, 8], strides = [1, 1]} : vector<32x16xf32> to vector<32x8xf32>
    %23 = math.tanh %22 : vector<32x8xf32>
    %24 = vector.extract_strided_slice %21 {offsets = [0, 8], sizes = [32, 8], strides = [1, 1]} : vector<32x16xf32> to vector<32x8xf32>
    %cst_13 = arith.constant 5.000000e-01 : f32
    %25 = vector.broadcast %cst_13 : f32 to vector<32x8xf32>
    %26 = arith.mulf %25, %24 : vector<32x8xf32>
    %27 = math.tanh %26 : vector<32x8xf32>
    %cst_14 = arith.constant 1.000000e+00 : f32
    %28 = vector.broadcast %cst_14 : f32 to vector<32x8xf32>
    %29 = arith.addf %27, %28 : vector<32x8xf32>
    %cst_15 = arith.constant 5.000000e-01 : f32
    %30 = vector.broadcast %cst_15 : f32 to vector<32x8xf32>
    %31 = arith.mulf %30, %29 : vector<32x8xf32>
    %32 = arith.mulf %23, %31 : vector<32x8xf32>
    %c0_16 = arith.constant 0 : index
    %c0_17 = arith.constant 0 : index
    %33 = vector.load %arg6[%c0_16, %c0_17] : memref<8x128xf32, #tpu.memory_space<vmem>>, vector<8x128xf32>
    %cst_18 = arith.constant dense<0.000000e+00> : vector<32x128xf32>
    %34 = tpu.matmul %32, %33, %cst_18 {dimension_numbers = #tpu.dot_dimension_numbers<[1], [0], [0], [1], [0, 0, 1, 1], [], []>} : vector<32x8xf32>, vector<8x128xf32>, vector<32x128xf32> -> vector<32x128xf32>
    %c0_19 = arith.constant 0 : index
    %c0_20 = arith.constant 0 : index
    %35 = vector.load %arg7[%c0_19, %c0_20] : memref<1x128xf32, #tpu.memory_space<vmem>>, vector<1x128xf32>
    %36 = vector.broadcast %35 : vector<1x128xf32> to vector<32x128xf32>
    %37 = arith.addf %34, %36 : vector<32x128xf32>
    %c0_21 = arith.constant 0 : index
    %c0_22 = arith.constant 0 : index
    %38 = vector.load %arg8[%c0_21, %c0_22] : memref<32x128xf32, #tpu.memory_space<vmem>>, vector<32x128xf32>
    tpu.vector_store %arg8[%c0_21, %c0_22], %37 {strides = array<i32>} : memref<32x128xf32, #tpu.memory_space<vmem>>, vector<32x128xf32>,
    return
  }
  func.func @transform_0(%arg0: i32) -> (i32, i32) {
    %c0_i32 = arith.constant 0 : i32
    %c0_i32_0 = arith.constant 0 : i32
    return %arg0, %c0_i32 : i32, i32
  }
  func.func @transform_1(%arg0: i32) -> (i32, i32) {
    %c0_i32 = arith.constant 0 : i32
    %c0_i32_0 = arith.constant 0 : i32
    %c0_i32_1 = arith.constant 0 : i32
    return %c0_i32, %c0_i32_0 : i32, i32
  }
  func.func @transform_2(%arg0: i32) -> (i32, i32) {
    %c0_i32 = arith.constant 0 : i32
    %c0_i32_0 = arith.constant 0 : i32
    %c0_i32_1 = arith.constant 0 : i32
    return %c0_i32, %c0_i32_0 : i32, i32
  }
  func.func @transform_3(%arg0: i32) -> (i32, i32) {
    %c0_i32 = arith.constant 0 : i32
    %c0_i32_0 = arith.constant 0 : i32
    %c0_i32_1 = arith.constant 0 : i32
    return %c0_i32, %c0_i32_0 : i32, i32
  }
  func.func @transform_4(%arg0: i32) -> (i32, i32) {
    %c0_i32 = arith.constant 0 : i32
    %c0_i32_0 = arith.constant 0 : i32
    %c0_i32_1 = arith.constant 0 : i32
    return %c0_i32, %c0_i32_0 : i32, i32
  }
  func.func @transform_5(%arg0: i32) -> (i32, i32) {
    %c0_i32 = arith.constant 0 : i32
    %c0_i32_0 = arith.constant 0 : i32
    %c0_i32_1 = arith.constant 0 : i32
    return %c0_i32, %c0_i32_0 : i32, i32
  }
  func.func @transform_6(%arg0: i32) -> (i32, i32) {
    %c0_i32 = arith.constant 0 : i32
    %c0_i32_0 = arith.constant 0 : i32
    %c0_i32_1 = arith.constant 0 : i32
    return %c0_i32, %c0_i32_0 : i32, i32
  }
  func.func @transform_7(%arg0: i32) -> (i32, i32) {
    %c0_i32 = arith.constant 0 : i32
    %c0_i32_0 = arith.constant 0 : i32
    return %arg0, %c0_i32 : i32, i32
  }
}

</mosaic_0001>

<bundles_post_ra>
// kernel: _attn_forward.1
= control target key start
LH: loop header
LB: loop body
LE: loop exit
PB: predicated region body
PF: predicated region fallthrough
CT: control target
= control target key end

     0   :  { %s929_s24 = smov 0   ;;  %s983_s0 = inlined_call_operand.vmem [shape: f32[64,32], index: 0, kind: input, shape index: {}]   ;;  %s984_s1 = inlined_call_operand.vmem [shape: f32[32,32], index: 1, kind: input, shape index: {}]   ;;  %s985_s2 = inlined_call_operand.vmem [shape: f32[1,32], index: 2, kind: input, shape index: {}]   ;;  %s986_s3 = inlined_call_operand.vmem [shape: f32[16,16], index: 3, kind: input, shape index: {}]   ;;  %s987_s4 = inlined_call_operand.vmem [shape: f32[1,16], index: 4, kind: input, shape index: {}]   ;;  %s988_s5 = inlined_call_operand.vmem [shape: f32[8,128], index: 5, kind: input, shape index: {}]   ;;  %s989_s6 = inlined_call_operand.vmem [shape: f32[1,128], index: 6, kind: input, shape index: {}]   ;;  %s990_s7 = inlined_call_operand.vmem [shape: f32[64,128], index: 7, kind: output, shape index: {}]  }
   0x1 LB: > { %s748_s25 = sadd.s32 4294967295, %s885_s24   ;;  %p752_p0 = scmp.ge.s32.totalorder %s885_s24, 1  ;;  %s885_s24 = sphi %s929_s24, %s17_s24  }
   0x2   : > { %p238_p1 = scmp.lt.s32.totalorder %s885_s24, 3 }
   0x4   : > { %p239_p2 = pnand %p752_p0, %p238_p1 }
   0x5   : > { %v286_v0 = vld [vmem:[%s984_s1] sm:$0xff] (!%p239_p2)  ;;  %v287_v1 = vld [vmem:[%s984_s1 + $0x8] sm:$0xff] (!%p239_p2)  ;;  %v288_v2 = vld [vmem:[%s984_s1 + $0x10] sm:$0xff] (!%p239_p2)  ;;  %s753_s9 = sshll.u32 (!%p239_p2), %s748_s25, 2  ;;  %vm297_vm0 = vcmask (!%p239_p2), 261120   ;;  %s887_s22 = smov (!%p239_p2), 112  }
   0x6   : > { %242 = sbr.rel (%p239_p2) target bundleno = 941 (0x3ad), region = 48  ;;  %v825_v3 = vpack.c.bf16 (!%p239_p2), %v287_v1, %v286_v0  ;;  %v289_v4 = vld [vmem:[%s984_s1 + $0x18] sm:$0xff] (!%p239_p2)  ;;  %p271_p3 = scmp.lt.s32.totalorder (!%p239_p2), %s753_s9, 7  ;;  %v757_v10 = vld [vmem:[%s985_s2] ss:$0 sm:$0xff] (!%p239_p2)  ;;  %v436_v23 = vld [vmem:[%s986_s3 + $0x8] sm:$0xff] (!%p239_p2) }
   0x7   : > { %v829_v5 = vpack.c.bf16 (!%p239_p2), %v289_v4, %v288_v2  ;;  %v435_v22 = vld [vmem:[%s986_s3] sm:$0xff] (!%p239_p2)  ;;  %vm444_vm1 = vcmask (!%p239_p2), 130048   ;;  %s888_s28 = smov (!%p239_p2), 120   ;;  %vm590_vm2 = vcmask (!%p239_p2), 64512  }
   0x8   : > { %826 = vmatprep.subr.bf16.mxu0 (!%p239_p2), %v825_v3  ;;  %v833_v25 = vpack.c.bf16 (!%p239_p2), %v436_v23, %v435_v22  ;;  %v582_v50 = vld [vmem:[%s988_s5] sm:$0xff] (!%p239_p2) }
   0x9   : > { %828 = vmatpush3.bf16.msra.mxu0 (!%p239_p2), %v825_v3  ;;  %v762_v51 = vld [vmem:[%s987_s4] ss:$0 sm:$0xff] (!%p239_p2) }
   0xa   : > { %830 = vmatprep.subr.bf16.mxu0 (!%p239_p2), %v829_v5  ;;  %834 = vmatprep.subr.bf16.mxu1 (!%p239_p2), %v833_v25 }
   0xb   : > { %836 = vmatpush3.bf16.msra.mxu1 (!%p239_p2), %v833_v25 }
   0xc   : > { %817 = vmatprep.subr.mxu1 (!%p239_p2), %v582_v50 }
   0xd   : > { %s992_s9 = smov (!%p271_p3, %s753_s9), 7  ;;  %832 = vmatpush3.bf16.msra.mxu0 %v829_v5 }
   0xe   : > { %s754_s12 = sshll.u32 %s992_s9, 3 }
   0xf   : > { %s274_s15 = scalar_lea.vmem %s983_s0, %s754_s12  ;;  %s280_s11 = scalar_lea.vmem %s990_s7, %s754_s12 }
  0x10   : > { %v282_v6 = vld [vmem:[%s274_s15] sm:$0xff]  ;;  %v283_v7 = vld [vmem:[%s274_s15 + $0x8] sm:$0xff]  ;;  %v284_v8 = vld [vmem:[%s274_s15 + $0x10] sm:$0xff] }
  0x11   : > { %801 = vmatprep.mubr.msk.f32.mxu0 %vm297_vm0, %v282_v6  ;;  %v285_v9 = vld [vmem:[%s274_s15 + $0x18] sm:$0xff] }
  0x12   : > { %802 = vmatmul.mubr.msk.f32.vlgmr.msra.gmra.mrb[0].mxu0 %vm297_vm0, %v283_v7 }
  0x13   : > { %804 = vmatprep.mubr.msk.f32.mxu0 %vm297_vm0, %v284_v8 }
  0x16   : > { %805 = vmatmul.mubr.msk.f32.gmra.mrb[2].mxu0 %vm297_vm0, %v285_v9 }
  0xe5   : > { %v803_v11 = vpop.f32.mrb[0].mxu0 }
  0xe6   : > { %v382_v12 = vadd.f32 %v803_v11, %v757_v10  ;;  %v376_v13 = vpop.f32.mrb[1].mxu0 }
  0xe7   : > { %v377_v14 = vadd.f32 %v757_v10, %v376_v13 }
  0xe8   : > { %v400_v15 = vmul.f32 0.5, %v382_v12 }
  0xe9   : > { %v399_v16 = vmul.f32 0.5, %v377_v14  ;;  %v806_v17 = vpop.f32.mrb[2].mxu0 }
  0xea   : > { %847 = vtanh.f32 %v400_v15  ;;  %v392_v18 = vadd.f32 %v806_v17, %v757_v10  ;;  %v386_v19 = vpop.f32.mrb[3].mxu0 }
  0xeb   : > { %849 = vtanh.f32 %v399_v16  ;;  %v387_v20 = vadd.f32 %v757_v10, %v386_v19 }
  0xec   : > { %v402_v21 = vmul.f32 0.5, %v392_v18 }
  0xed   : > { %v401_v24 = vmul.f32 0.5, %v387_v20 }
  0xee   : > { %851 = vtanh.f32 %v402_v21 }
  0xef   : > { %853 = vtanh.f32 %v401_v24  ;;  %v767_v24 = vld [vmem:[%s989_s6] ss:$0 sm:$0xff] }
  0xf0   : > { %855 = vtanh.f32 %v377_v14 }
  0xf1   : > { %857 = vtanh.f32 %v382_v12 }
  0xf2   : > { %859 = vtanh.f32 %v387_v20 }
  0xf3   : > { %861 = vtanh.f32 %v392_v18 }
  0xf4   : > { %v848_v26 = vpop.eup %847 }
  0xf5   : > { %v850_v27 = vpop.eup %849  ;;  %v408_v31 = vadd.f32 1.0, %v848_v26 }
  0xf6   : > { %v407_v28 = vadd.f32 1.0, %v850_v27 }
  0xf7   : > { %v412_v35 = vmul.f32 0.5, %v408_v31 }
  0xf8   : > { %v852_v29 = vpop.eup %851  ;;  %v411_v30 = vmul.f32 0.5, %v407_v28 }
  0xf9   : > { %v854_v32 = vpop.eup %853  ;;  %v410_v36 = vadd.f32 1.0, %v852_v29 }
  0xfa   : > { %419 = vrot.lane.b32.xlu0 %v411_v30, %s887_s22  ;;  %v409_v33 = vadd.f32 1.0, %v854_v32  ;;  %v856_v38 = vpop.eup %855 }
  0xfb   : > { %v414_v37 = vmul.f32 0.5, %v410_v36  ;;  %v858_v41 = vpop.eup %857 }
  0xfc   : > { %v413_v34 = vmul.f32 0.5, %v409_v33  ;;  %v860_v42 = vpop.eup %859 }
  0xfd   : > { %v862_v47 = vpop.eup %861 }
  0xfe   : > { %423 = vrot.lane.b32.xlu1 %v413_v34, %s887_s22  ;;  %421 = vrot.lane.b32.xlu0 %v412_v35, %s887_s22 }
 0x102   : > { %425 = vrot.lane.b32.xlu1 %v414_v37, %s887_s22 }
 0x16c   : > { %v420_v39 = vpop.permute.xlu0 %419 }
 0x16d   : > { %v431_v40 = vmul.f32 %v856_v38, %v420_v39 }
 0x16f   : > { %811 = vmatprep.mubr.msk.f32.mxu1 %vm444_vm1, %v431_v40 }
 0x170   : > { %v424_v43 = vpop.permute.xlu1 %423  ;;  %v422_v44 = vpop.permute.xlu0 %421 }
 0x171   : > { %v433_v45 = vmul.f32 %v860_v42, %v424_v43  ;;  %v432_v46 = vmul.f32 %v858_v41, %v422_v44 }
 0x173   : > { %812 = vmatmul.mubr.msk.f32.vlgmr.msra.gmra.mrb[0].mxu1 %vm444_vm1, %v432_v46 }
 0x174   : > { %v426_v48 = vpop.permute.xlu1 %425  ;;  %814 = vmatprep.mubr.msk.f32.mxu1 %vm444_vm1, %v433_v45  ;;  %818 = vmatpush3.msra.mxu1 %v582_v50 }
 0x175   : > { %v434_v49 = vmul.f32 %v862_v47, %v426_v48 }
 0x177   : > { %815 = vmatmul.mubr.msk.f32.gmra.mrb[2].mxu1 %vm444_vm1, %v434_v49 }
 0x246   : > { %v813_v52 = vpop.f32.mrb[0].mxu1 }
 0x247   : > { %v529_v53 = vadd.f32 %v813_v52, %v762_v51  ;;  %v523_v54 = vpop.f32.mrb[1].mxu1 }
 0x248   : > { %v524_v55 = vadd.f32 %v762_v51, %v523_v54 }
 0x249   : > { %v547_v56 = vmul.f32 0.5, %v529_v53 }
 0x24a   : > { %v546_v57 = vmul.f32 0.5, %v524_v55  ;;  %v816_v58 = vpop.f32.mrb[2].mxu1 }
 0x24b   : > { %863 = vtanh.f32 %v547_v56  ;;  %v539_v59 = vadd.f32 %v816_v58, %v762_v51  ;;  %v533_v60 = vpop.f32.mrb[3].mxu1 }
 0x24c   : > { %865 = vtanh.f32 %v546_v57  ;;  %v534_v61 = vadd.f32 %v762_v51, %v533_v60 }
 0x24d   : > { %v549_v62 = vmul.f32 0.5, %v539_v59 }
 0x24e   : > { %v548_v63 = vmul.f32 0.5, %v534_v61 }
 0x24f   : > { %867 = vtanh.f32 %v549_v62 }
 0x250   : > { %869 = vtanh.f32 %v548_v63 }
 0x251   : > { %871 = vtanh.f32 %v524_v55 }
 0x252   : > { %873 = vtanh.f32 %v529_v53 }
 0x253   : > { %875 = vtanh.f32 %v534_v61 }
 0x254   : > { %877 = vtanh.f32 %v539_v59 }
 0x255   : > { %v864_v0 = vpop.eup %863 }
 0x256   : > { %v866_v1 = vpop.eup %865  ;;  %v555_v2 = vadd.f32 1.0, %v864_v0 }
 0x257   : > { %v554_v3 = vadd.f32 1.0, %v866_v1 }
 0x258   : > { %v559_v4 = vmul.f32 0.5, %v555_v2 }
 0x259   : > { %v868_v5 = vpop.eup %867  ;;  %v558_v6 = vmul.f32 0.5, %v554_v3 }
 0x25a   : > { %v870_v7 = vpop.eup %869  ;;  %568 = vrot.lane.b32.xlu1 %v559_v4, %s888_s28  ;;  %v557_v8 = vadd.f32 1.0, %v868_v5 }
 0x25b   : > { %566 = vrot.lane.b32.xlu0 %v558_v6, %s888_s28  ;;  %v556_v9 = vadd.f32 1.0, %v870_v7  ;;  %v872_v13 = vpop.eup %871 }
 0x25c   : > { %v561_v10 = vmul.f32 0.5, %v557_v8  ;;  %v874_v15 = vpop.eup %873 }
 0x25d   : > { %v560_v11 = vmul.f32 0.5, %v556_v9  ;;  %v876_v19 = vpop.eup %875 }
 0x25e   : > { %572 = vrot.lane.b32.xlu1 %v561_v10, %s888_s28  ;;  %v878_v21 = vpop.eup %877 }
 0x25f   : > { %570 = vrot.lane.b32.xlu0 %v560_v11, %s888_s28 }
 0x2cc   : > { %v569_v12 = vpop.permute.xlu1 %568 }
 0x2cd   : > { %v567_v14 = vpop.permute.xlu0 %566  ;;  %v579_v17 = vmul.f32 %v874_v15, %v569_v12 }
 0x2ce   : > { %v578_v16 = vmul.f32 %v872_v13, %v567_v14 }
 0x2d0   : > { %v573_v18 = vpop.permute.xlu1 %572  ;;  %819 = vmatprep.mubr.msk.f32.mxu1 %vm590_vm2, %v578_v16 }
 0x2d1   : > { %v571_v20 = vpop.permute.xlu0 %570  ;;  %820 = vmatmul.mubr.msk.f32.vlgmr.msra.gmra.mrb[4].mxu1 %vm590_vm2, %v579_v17  ;;  %v581_v23 = vmul.f32 %v878_v21, %v573_v18 }
 0x2d2   : > { %v580_v22 = vmul.f32 %v876_v19, %v571_v20 }
 0x2d4   : > { %822 = vmatprep.mubr.msk.f32.mxu1 %vm590_vm2, %v580_v22 }
 0x2d5   : > { %823 = vmatmul.mubr.msk.f32.gmra.mrb[6].mxu1 %vm590_vm2, %v581_v23 }
 0x3a4   : > { %v821_v25 = vpop.f32.mrb[4].mxu1 }
 0x3a5   : > { %v669_v26 = vpop.f32.mrb[5].mxu1  ;;  %v675_v28 = vadd.f32 %v821_v25, %v767_v24 }
 0x3a6   : > { %v670_v27 = vadd.f32 %v767_v24, %v669_v26 }
 0x3a7   : > { %689 = vst [vmem:[%s280_s11 + $0x8] sm:$0xff] %v675_v28 }
 0x3a8   : > { %688 = vst [vmem:[%s280_s11] sm:$0xff] %v670_v27  ;;  %v824_v29 = vpop.f32.mrb[6].mxu1 }
 0x3a9   : > { %v679_v30 = vpop.f32.mrb[7].mxu1  ;;  %v685_v32 = vadd.f32 %v824_v29, %v767_v24 }
 0x3aa   : > { %v680_v31 = vadd.f32 %v767_v24, %v679_v30 }
 0x3ab   : > { %691 = vst [vmem:[%s280_s11 + $0x18] sm:$0xff] %v685_v32 }
 0x3ac   : > { %690 = vst [vmem:[%s280_s11 + $0x10] sm:$0xff] %v680_v31 }
 0x3ad PF: > { %s17_s24 = sadd.s32 1, %s885_s24  }
 0x3ae   : > { %p14_p4 = scmp.ge.s32.totalorder %s17_s24, 4  }
 0x3b0   :  { %16 = sbr.rel (!%p14_p4) target bundleno = 1 (0x1), region = 78 }

// kernel: _attn_forward.1
= control target key start
LH: loop header
LB: loop body
LE: loop exit
PB: predicated region body
PF: predicated region fallthrough
CT: control target
= control target key end

     0   :  { %s929_s24 = smov 0   ;;  %s983_s0 = inlined_call_operand.vmem [shape: f32[64,32], index: 0, kind: input, shape index: {}]   ;;  %s984_s1 = inlined_call_operand.vmem [shape: f32[32,32], index: 1, kind: input, shape index: {}]   ;;  %s985_s2 = inlined_call_operand.vmem [shape: f32[1,32], index: 2, kind: input, shape index: {}]   ;;  %s986_s3 = inlined_call_operand.vmem [shape: f32[16,16], index: 3, kind: input, shape index: {}]   ;;  %s987_s4 = inlined_call_operand.vmem [shape: f32[1,16], index: 4, kind: input, shape index: {}]   ;;  %s988_s5 = inlined_call_operand.vmem [shape: f32[8,128], index: 5, kind: input, shape index: {}]   ;;  %s989_s6 = inlined_call_operand.vmem [shape: f32[1,128], index: 6, kind: input, shape index: {}]   ;;  %s990_s7 = inlined_call_operand.vmem [shape: f32[64,128], index: 7, kind: output, shape index: {}]  }
   0x1 LB: > { %s748_s25 = sadd.s32 4294967295, %s885_s24   ;;  %p752_p0 = scmp.ge.s32.totalorder %s885_s24, 1  ;;  %s885_s24 = sphi %s929_s24, %s17_s24  }
   0x2   : > { %p238_p1 = scmp.lt.s32.totalorder %s885_s24, 3 }
   0x4   : > { %p239_p2 = pnand %p752_p0, %p238_p1 }
   0x5   : > { %v286_v0 = vld [vmem:[%s984_s1] sm:$0xff] (!%p239_p2)  ;;  %v287_v1 = vld [vmem:[%s984_s1 + $0x8] sm:$0xff] (!%p239_p2)  ;;  %v288_v2 = vld [vmem:[%s984_s1 + $0x10] sm:$0xff] (!%p239_p2)  ;;  %s753_s9 = sshll.u32 (!%p239_p2), %s748_s25, 2  ;;  %vm297_vm0 = vcmask (!%p239_p2), 261120   ;;  %s887_s22 = smov (!%p239_p2), 112  }
   0x6   : > { %242 = sbr.rel (%p239_p2) target bundleno = 941 (0x3ad), region = 48  ;;  %v825_v3 = vpack.c.bf16 (!%p239_p2), %v287_v1, %v286_v0  ;;  %v289_v4 = vld [vmem:[%s984_s1 + $0x18] sm:$0xff] (!%p239_p2)  ;;  %p271_p3 = scmp.lt.s32.totalorder (!%p239_p2), %s753_s9, 7  ;;  %v757_v10 = vld [vmem:[%s985_s2] ss:$0 sm:$0xff] (!%p239_p2)  ;;  %v436_v23 = vld [vmem:[%s986_s3 + $0x8] sm:$0xff] (!%p239_p2) }
   0x7   : > { %v829_v5 = vpack.c.bf16 (!%p239_p2), %v289_v4, %v288_v2  ;;  %v435_v22 = vld [vmem:[%s986_s3] sm:$0xff] (!%p239_p2)  ;;  %vm444_vm1 = vcmask (!%p239_p2), 130048   ;;  %s888_s28 = smov (!%p239_p2), 120   ;;  %vm590_vm2 = vcmask (!%p239_p2), 64512  }
   0x8   : > { %826 = vmatprep.subr.bf16.mxu0 (!%p239_p2), %v825_v3  ;;  %v833_v25 = vpack.c.bf16 (!%p239_p2), %v436_v23, %v435_v22  ;;  %v582_v50 = vld [vmem:[%s988_s5] sm:$0xff] (!%p239_p2) }
   0x9   : > { %828 = vmatpush3.bf16.msra.mxu0 (!%p239_p2), %v825_v3  ;;  %v762_v51 = vld [vmem:[%s987_s4] ss:$0 sm:$0xff] (!%p239_p2) }
   0xa   : > { %830 = vmatprep.subr.bf16.mxu0 (!%p239_p2), %v829_v5  ;;  %834 = vmatprep.subr.bf16.mxu1 (!%p239_p2), %v833_v25 }
   0xb   : > { %836 = vmatpush3.bf16.msra.mxu1 (!%p239_p2), %v833_v25 }
   0xc   : > { %817 = vmatprep.subr.mxu1 (!%p239_p2), %v582_v50 }
   0xd   : > { %s992_s9 = smov (!%p271_p3, %s753_s9), 7  ;;  %832 = vmatpush3.bf16.msra.mxu0 %v829_v5 }
   0xe   : > { %s754_s12 = sshll.u32 %s992_s9, 3 }
   0xf   : > { %s274_s15 = scalar_lea.vmem %s983_s0, %s754_s12  ;;  %s280_s11 = scalar_lea.vmem %s990_s7, %s754_s12 }
  0x10   : > { %v282_v6 = vld [vmem:[%s274_s15] sm:$0xff]  ;;  %v283_v7 = vld [vmem:[%s274_s15 + $0x8] sm:$0xff]  ;;  %v284_v8 = vld [vmem:[%s274_s15 + $0x10] sm:$0xff] }
  0x11   : > { %801 = vmatprep.mubr.msk.f32.mxu0 %vm297_vm0, %v282_v6  ;;  %v285_v9 = vld [vmem:[%s274_s15 + $0x18] sm:$0xff] }
  0x12   : > { %802 = vmatmul.mubr.msk.f32.vlgmr.msra.gmra.mrb[0].mxu0 %vm297_vm0, %v283_v7 }
  0x13   : > { %804 = vmatprep.mubr.msk.f32.mxu0 %vm297_vm0, %v284_v8 }
  0x16   : > { %805 = vmatmul.mubr.msk.f32.gmra.mrb[2].mxu0 %vm297_vm0, %v285_v9 }
  0xe5   : > { %v803_v11 = vpop.f32.mrb[0].mxu0 }
  0xe6   : > { %v382_v12 = vadd.f32 %v803_v11, %v757_v10  ;;  %v376_v13 = vpop.f32.mrb[1].mxu0 }
  0xe7   : > { %v377_v14 = vadd.f32 %v757_v10, %v376_v13 }
  0xe8   : > { %v400_v15 = vmul.f32 0.5, %v382_v12 }
  0xe9   : > { %v399_v16 = vmul.f32 0.5, %v377_v14  ;;  %v806_v17 = vpop.f32.mrb[2].mxu0 }
  0xea   : > { %847 = vtanh.f32 %v400_v15  ;;  %v392_v18 = vadd.f32 %v806_v17, %v757_v10  ;;  %v386_v19 = vpop.f32.mrb[3].mxu0 }
  0xeb   : > { %849 = vtanh.f32 %v399_v16  ;;  %v387_v20 = vadd.f32 %v757_v10, %v386_v19 }
  0xec   : > { %v402_v21 = vmul.f32 0.5, %v392_v18 }
  0xed   : > { %v401_v24 = vmul.f32 0.5, %v387_v20 }
  0xee   : > { %851 = vtanh.f32 %v402_v21 }
  0xef   : > { %853 = vtanh.f32 %v401_v24  ;;  %v767_v24 = vld [vmem:[%s989_s6] ss:$0 sm:$0xff] }
  0xf0   : > { %855 = vtanh.f32 %v377_v14 }
  0xf1   : > { %857 = vtanh.f32 %v382_v12 }
  0xf2   : > { %859 = vtanh.f32 %v387_v20 }
  0xf3   : > { %861 = vtanh.f32 %v392_v18 }
  0xf4   : > { %v848_v26 = vpop.eup %847 }
  0xf5   : > { %v850_v27 = vpop.eup %849  ;;  %v408_v31 = vadd.f32 1.0, %v848_v26 }
  0xf6   : > { %v407_v28 = vadd.f32 1.0, %v850_v27 }
  0xf7   : > { %v412_v35 = vmul.f32 0.5, %v408_v31 }
  0xf8   : > { %v852_v29 = vpop.eup %851  ;;  %v411_v30 = vmul.f32 0.5, %v407_v28 }
  0xf9   : > { %v854_v32 = vpop.eup %853  ;;  %v410_v36 = vadd.f32 1.0, %v852_v29 }
  0xfa   : > { %419 = vrot.lane.b32.xlu0 %v411_v30, %s887_s22  ;;  %v409_v33 = vadd.f32 1.0, %v854_v32  ;;  %v856_v38 = vpop.eup %855 }
  0xfb   : > { %v414_v37 = vmul.f32 0.5, %v410_v36  ;;  %v858_v41 = vpop.eup %857 }
  0xfc   : > { %v413_v34 = vmul.f32 0.5, %v409_v33  ;;  %v860_v42 = vpop.eup %859 }
  0xfd   : > { %v862_v47 = vpop.eup %861 }
  0xfe   : > { %423 = vrot.lane.b32.xlu1 %v413_v34, %s887_s22  ;;  %421 = vrot.lane.b32.xlu0 %v412_v35, %s887_s22 }
 0x102   : > { %425 = vrot.lane.b32.xlu1 %v414_v37, %s887_s22 }
 0x16c   : > { %v420_v39 = vpop.permute.xlu0 %419 }
 0x16d   : > { %v431_v40 = vmul.f32 %v856_v38, %v420_v39 }
 0x16f   : > { %811 = vmatprep.mubr.msk.f32.mxu1 %vm444_vm1, %v431_v40 }
 0x170   : > { %v424_v43 = vpop.permute.xlu1 %423  ;;  %v422_v44 = vpop.permute.xlu0 %421 }
 0x171   : > { %v433_v45 = vmul.f32 %v860_v42, %v424_v43  ;;  %v432_v46 = vmul.f32 %v858_v41, %v422_v44 }
 0x173   : > { %812 = vmatmul.mubr.msk.f32.vlgmr.msra.gmra.mrb[0].mxu1 %vm444_vm1, %v432_v46 }
 0x174   : > { %v426_v48 = vpop.permute.xlu1 %425  ;;  %814 = vmatprep.mubr.msk.f32.mxu1 %vm444_vm1, %v433_v45  ;;  %818 = vmatpush3.msra.mxu1 %v582_v50 }
 0x175   : > { %v434_v49 = vmul.f32 %v862_v47, %v426_v48 }
 0x177   : > { %815 = vmatmul.mubr.msk.f32.gmra.mrb[2].mxu1 %vm444_vm1, %v434_v49 }
 0x246   : > { %v813_v52 = vpop.f32.mrb[0].mxu1 }
 0x247   : > { %v529_v53 = vadd.f32 %v813_v52, %v762_v51  ;;  %v523_v54 = vpop.f32.mrb[1].mxu1 }
 0x248   : > { %v524_v55 = vadd.f32 %v762_v51, %v523_v54 }
 0x249   : > { %v547_v56 = vmul.f32 0.5, %v529_v53 }
 0x24a   : > { %v546_v57 = vmul.f32 0.5, %v524_v55  ;;  %v816_v58 = vpop.f32.mrb[2].mxu1 }
 0x24b   : > { %863 = vtanh.f32 %v547_v56  ;;  %v539_v59 = vadd.f32 %v816_v58, %v762_v51  ;;  %v533_v60 = vpop.f32.mrb[3].mxu1 }
 0x24c   : > { %865 = vtanh.f32 %v546_v57  ;;  %v534_v61 = vadd.f32 %v762_v51, %v533_v60 }
 0x24d   : > { %v549_v62 = vmul.f32 0.5, %v539_v59 }
 0x24e   : > { %v548_v63 = vmul.f32 0.5, %v534_v61 }
 0x24f   : > { %867 = vtanh.f32 %v549_v62 }
 0x250   : > { %869 = vtanh.f32 %v548_v63 }
 0x251   : > { %871 = vtanh.f32 %v524_v55 }
 0x252   : > { %873 = vtanh.f32 %v529_v53 }
 0x253   : > { %875 = vtanh.f32 %v534_v61 }
 0x254   : > { %877 = vtanh.f32 %v539_v59 }
 0x255   : > { %v864_v0 = vpop.eup %863 }
 0x256   : > { %v866_v1 = vpop.eup %865  ;;  %v555_v2 = vadd.f32 1.0, %v864_v0 }
 0x257   : > { %v554_v3 = vadd.f32 1.0, %v866_v1 }
 0x258   : > { %v559_v4 = vmul.f32 0.5, %v555_v2 }
 0x259   : > { %v868_v5 = vpop.eup %867  ;;  %v558_v6 = vmul.f32 0.5, %v554_v3 }
 0x25a   : > { %v870_v7 = vpop.eup %869  ;;  %568 = vrot.lane.b32.xlu1 %v559_v4, %s888_s28  ;;  %v557_v8 = vadd.f32 1.0, %v868_v5 }
 0x25b   : > { %566 = vrot.lane.b32.xlu0 %v558_v6, %s888_s28  ;;  %v556_v9 = vadd.f32 1.0, %v870_v7  ;;  %v872_v13 = vpop.eup %871 }
 0x25c   : > { %v561_v10 = vmul.f32 0.5, %v557_v8  ;;  %v874_v15 = vpop.eup %873 }
 0x25d   : > { %v560_v11 = vmul.f32 0.5, %v556_v9  ;;  %v876_v19 = vpop.eup %875 }
 0x25e   : > { %572 = vrot.lane.b32.xlu1 %v561_v10, %s888_s28  ;;  %v878_v21 = vpop.eup %877 }
 0x25f   : > { %570 = vrot.lane.b32.xlu0 %v560_v11, %s888_s28 }
 0x2cc   : > { %v569_v12 = vpop.permute.xlu1 %568 }
 0x2cd   : > { %v567_v14 = vpop.permute.xlu0 %566  ;;  %v579_v17 = vmul.f32 %v874_v15, %v569_v12 }
 0x2ce   : > { %v578_v16 = vmul.f32 %v872_v13, %v567_v14 }
 0x2d0   : > { %v573_v18 = vpop.permute.xlu1 %572  ;;  %819 = vmatprep.mubr.msk.f32.mxu1 %vm590_vm2, %v578_v16 }
 0x2d1   : > { %v571_v20 = vpop.permute.xlu0 %570  ;;  %820 = vmatmul.mubr.msk.f32.vlgmr.msra.gmra.mrb[4].mxu1 %vm590_vm2, %v579_v17  ;;  %v581_v23 = vmul.f32 %v878_v21, %v573_v18 }
 0x2d2   : > { %v580_v22 = vmul.f32 %v876_v19, %v571_v20 }
 0x2d4   : > { %822 = vmatprep.mubr.msk.f32.mxu1 %vm590_vm2, %v580_v22 }
 0x2d5   : > { %823 = vmatmul.mubr.msk.f32.gmra.mrb[6].mxu1 %vm590_vm2, %v581_v23 }
 0x3a4   : > { %v821_v25 = vpop.f32.mrb[4].mxu1 }
 0x3a5   : > { %v669_v26 = vpop.f32.mrb[5].mxu1  ;;  %v675_v28 = vadd.f32 %v821_v25, %v767_v24 }
 0x3a6   : > { %v670_v27 = vadd.f32 %v767_v24, %v669_v26 }
 0x3a7   : > { %689 = vst [vmem:[%s280_s11 + $0x8] sm:$0xff] %v675_v28 }
 0x3a8   : > { %688 = vst [vmem:[%s280_s11] sm:$0xff] %v670_v27  ;;  %v824_v29 = vpop.f32.mrb[6].mxu1 }
 0x3a9   : > { %v679_v30 = vpop.f32.mrb[7].mxu1  ;;  %v685_v32 = vadd.f32 %v824_v29, %v767_v24 }
 0x3aa   : > { %v680_v31 = vadd.f32 %v767_v24, %v679_v30 }
 0x3ab   : > { %691 = vst [vmem:[%s280_s11 + $0x18] sm:$0xff] %v685_v32 }
 0x3ac   : > { %690 = vst [vmem:[%s280_s11 + $0x10] sm:$0xff] %v680_v31 }
 0x3ad PF: > { %s17_s24 = sadd.s32 1, %s885_s24  }
 0x3ae   : > { %p14_p4 = scmp.ge.s32.totalorder %s17_s24, 4  }
 0x3b0   :  { %16 = sbr.rel (!%p14_p4) target bundleno = 1 (0x1), region = 78 }

</bundles_post_ra>
